<compile_context>
chip_gen: v5e
topology: v5e:2x2
jax: 0.10.0
libtpu: 0.0.40
codegen_flags: <defaults>
</compile_context>

<pallas_src>
import jax
import jax.numpy as jnp
from jax.experimental import pallas as pl
from jax.experimental.pallas import tpu as pltpu


def _round_up(n, m):
    return ((n + m - 1) // m) * m


def _actnorm_kernel(x_ref, scale_ref, shift_ref, y_ref):
    # x_ref/y_ref: (TB, TF) tiles; scale_ref/shift_ref: (1, TF) f32 tiles.
    # Streaming FMA -> HBM-bandwidth bound. Math in f32 (free at the roofline,
    # keeps bf16 inputs exact on v5e which has no bf16 VALU); cast on store so
    # the HBM write stays narrow.
    x = x_ref[...].astype(jnp.float32)
    y_ref[...] = (scale_ref[...] * x + shift_ref[...]).astype(y_ref.dtype)


def actnorm_forward(x, log_scale, shift, *, max_rows_per_tile=None, max_cols_per_tile=None):
    """ActNorm forward. x: (B, F); log_scale, shift: (F,). Returns (y, logabsdet).

    max_rows_per_tile / max_cols_per_tile are testing overrides to force the
    ragged-edge (masked) grid paths at small shapes.
    """
    B, F = x.shape
    out_dtype = x.dtype
    itemsize = jnp.dtype(out_dtype).itemsize

    # Hoisted parameter prep: exp runs once here, not once per grid step.
    ls32 = log_scale.astype(jnp.float32)
    scale = jnp.exp(ls32).reshape(1, F)
    shift32 = shift.astype(jnp.float32).reshape(1, F)

    # --- tile sizing --------------------------------------------------------
    # Per grid step the pipeline holds 2 x-tiles + 2 y-tiles (double-buffered
    # input and output streams). Budget their sum at ~24 MiB; the scoped VMEM
    # limit is raised to 32 MiB below, which every generation supports.
    TILE_BUDGET = 24 * 1024 * 1024
    per_tile = TILE_BUDGET // 4

    # Column tiling only as a guard for extremely wide F (so that even an
    # 8-row tile fits in the budget). Otherwise keep full-F, padding-free
    # blocks; blocks narrower than F must be multiples of 128 lanes.
    if max_cols_per_tile is not None:
        TF = (max(128, max_cols_per_tile) // 128) * 128
    elif F * 8 * itemsize > per_tile:
        TF = max(128, (per_tile // (8 * itemsize)) // 128 * 128)
    else:
        TF = F
    TF = min(TF, F)

    rows = per_tile // max(1, TF * itemsize)
    if max_rows_per_tile is not None:
        rows = min(rows, max_rows_per_tile)
    if B <= 8:
        TB = B                                   # block dim == full array dim: always legal
    else:
        TB = max(8, (rows // 8) * 8)             # multiple of 8 sublanes
        TB = min(TB, _round_up(B, 8))            # don't exceed the batch (mod 8)

    grid = (pl.cdiv(B, TB), pl.cdiv(F, TF))

    cost = pl.CostEstimate(
        flops=2 * B * F,
        transcendentals=0,
        bytes_accessed=2 * B * F * itemsize + 2 * F * 4,
    )

    y = pl.pallas_call(
        _actnorm_kernel,
        out_shape=jax.ShapeDtypeStruct((B, F), out_dtype),
        grid=grid,
        in_specs=[
            pl.BlockSpec((TB, TF), lambda i, j: (i, j)),   # x streams
            pl.BlockSpec((1, TF), lambda i, j: (0, j)),    # scale (tiny)
            pl.BlockSpec((1, TF), lambda i, j: (0, j)),    # shift (tiny)
        ],
        out_specs=pl.BlockSpec((TB, TF), lambda i, j: (i, j)),
        compiler_params=pltpu.CompilerParams(
            dimension_semantics=("parallel", "parallel"),  # shard rows/cols on v7x's 2 TCs
            vmem_limit_bytes=32 * 1024 * 1024,             # <= physical VMEM on v5e/v6e/v7x
        ),
        cost_estimate=cost,
    )(x, scale, shift32)

    # logabsdet depends only on the (F,) parameter: compute in the wrapper in
    # f32 and cast explicitly (matches sum(log_scale) * ones(batch_size)).
    logabsdet = jnp.full((B,), jnp.sum(ls32)).astype(out_dtype)
    return y, logabsdet


def actnorm_forward_ref(x, log_scale, shift):
    ls32 = log_scale.astype(jnp.float32)
    scale = jnp.exp(ls32).reshape(1, -1)
    y = (scale * x.astype(jnp.float32) + shift.astype(jnp.float32).reshape(1, -1)).astype(x.dtype)
    ld = jnp.full((x.shape[0],), jnp.sum(ls32)).astype(x.dtype)
    return y, ld


if __name__ == "__main__":
    key = jax.random.PRNGKey(0)
    k_x, k_ls, k_sh, k_x2, k_x3 = jax.random.split(key, 5)

    # Case 1: tiny shape matching the module's 2D forward path.
    B, F = 2, 32
    x = jax.random.normal(k_x, (B, F), dtype=jnp.float32)
    log_scale = 0.1 * jax.random.normal(k_ls, (F,), dtype=jnp.float32)
    shift = jax.random.normal(k_sh, (F,), dtype=jnp.float32)
    y, ld = actnorm_forward(x, log_scale, shift)
    jax.block_until_ready((y, ld))
    y_ref, ld_ref = actnorm_forward_ref(x, log_scale, shift)
    assert y.shape == (B, F) and ld.shape == (B,)
    assert jnp.allclose(y, y_ref, atol=1e-5, rtol=1e-5), "outputs mismatch"
    assert jnp.allclose(ld, ld_ref, atol=1e-5, rtol=1e-5), "logabsdet mismatch"

    # Case 2: multi-step row grid with a ragged last row block (B % TB != 0):
    # exercises the padding-free cdiv path with masked edge stores.
    B2, F2 = 20, 256
    x2 = jax.random.normal(k_x2, (B2, F2), dtype=jnp.float32)
    ls2 = 0.05 * jax.random.normal(k_ls, (F2,), dtype=jnp.float32)
    sh2 = jax.random.normal(k_sh, (F2,), dtype=jnp.float32)
    y2, ld2 = actnorm_forward(x2, ls2, sh2, max_rows_per_tile=8)
    jax.block_until_ready((y2, ld2))
    y2_ref, ld2_ref = actnorm_forward_ref(x2, ls2, sh2)
    assert jnp.allclose(y2, y2_ref, atol=1e-5, rtol=1e-5), "outputs mismatch (case 2)"
    assert jnp.allclose(ld2, ld2_ref, atol=1e-5, rtol=1e-5), "logabsdet mismatch (case 2)"

    # Case 3: ragged column tiling (F % TF != 0) with a bf16 input.
    B3, F3 = 16, 200
    x3 = jax.random.normal(k_x3, (B3, F3), dtype=jnp.float32).astype(jnp.bfloat16)
    ls3 = 0.05 * jax.random.normal(k_ls, (F3,), dtype=jnp.float32)
    sh3 = jax.random.normal(k_sh, (F3,), dtype=jnp.float32)
    y3, ld3 = actnorm_forward(x3, ls3, sh3, max_cols_per_tile=128)
    jax.block_until_ready((y3, ld3))
    y3_ref, ld3_ref = actnorm_forward_ref(x3, ls3, sh3)
    assert jnp.allclose(y3.astype(jnp.float32), y3_ref.astype(jnp.float32),
                        atol=2e-2, rtol=2e-2), "outputs mismatch (case 3)"
    assert jnp.allclose(ld3.astype(jnp.float32), ld3_ref.astype(jnp.float32),
                        atol=2e-2, rtol=2e-2), "logabsdet mismatch (case 3)"

    print("KERNEL_OK")
</pallas_src>

<mosaic_0001>
module attributes {stable_mosaic.version = 11 : i64} {
  func.func @_actnorm_kernel(%arg0: i32, %arg1: i32, %arg2: memref<2x32xf32, #tpu.memory_space<vmem>>, %arg3: memref<1x32xf32, #tpu.memory_space<vmem>>, %arg4: memref<1x32xf32, #tpu.memory_space<vmem>>, %arg5: memref<2x32xf32, #tpu.memory_space<vmem>>) attributes {dimension_semantics = [#tpu.dimension_semantics<parallel>, #tpu.dimension_semantics<parallel>], iteration_bounds = array<i64: 1, 1>, scalar_prefetch = 0 : i64, scratch_operands = 0 : i64, tpu.core_type = #tpu.core_type<tc>, window_params = [{transform_indices = @transform_0, window_bounds = array<i64: 2, 32>}, {transform_indices = @transform_1, window_bounds = array<i64: 1, 32>}, {transform_indices = @transform_2, window_bounds = array<i64: 1, 32>}, {transform_indices = @transform_3, window_bounds = array<i64: 2, 32>}]} {
    %c0 = arith.constant 0 : index
    %c0_0 = arith.constant 0 : index
    %0 = vector.load %arg2[%c0, %c0_0] : memref<2x32xf32, #tpu.memory_space<vmem>>, vector<2x32xf32>
    %c0_1 = arith.constant 0 : index
    %c0_2 = arith.constant 0 : index
    %1 = vector.load %arg3[%c0_1, %c0_2] : memref<1x32xf32, #tpu.memory_space<vmem>>, vector<1x32xf32>
    %2 = vector.broadcast %1 : vector<1x32xf32> to vector<2x32xf32>
    %3 = arith.mulf %2, %0 : vector<2x32xf32>
    %c0_3 = arith.constant 0 : index
    %c0_4 = arith.constant 0 : index
    %4 = vector.load %arg4[%c0_3, %c0_4] : memref<1x32xf32, #tpu.memory_space<vmem>>, vector<1x32xf32>
    %5 = vector.broadcast %4 : vector<1x32xf32> to vector<2x32xf32>
    %6 = arith.addf %3, %5 : vector<2x32xf32>
    %c0_5 = arith.constant 0 : index
    %c0_6 = arith.constant 0 : index
    %7 = vector.load %arg5[%c0_5, %c0_6] : memref<2x32xf32, #tpu.memory_space<vmem>>, vector<2x32xf32>
    tpu.vector_store %arg5[%c0_5, %c0_6], %6 {strides = array<i32>} : memref<2x32xf32, #tpu.memory_space<vmem>>, vector<2x32xf32>,
    return
  }
  func.func @transform_0(%arg0: i32, %arg1: i32) -> (i32, i32) {
    %c0_i32 = arith.constant 0 : i32
    return %arg0, %arg1 : i32, i32
  }
  func.func @transform_1(%arg0: i32, %arg1: i32) -> (i32, i32) {
    %c0_i32 = arith.constant 0 : i32
    %c0_i32_0 = arith.constant 0 : i32
    return %c0_i32, %arg1 : i32, i32
  }
  func.func @transform_2(%arg0: i32, %arg1: i32) -> (i32, i32) {
    %c0_i32 = arith.constant 0 : i32
    %c0_i32_0 = arith.constant 0 : i32
    return %c0_i32, %arg1 : i32, i32
  }
  func.func @transform_3(%arg0: i32, %arg1: i32) -> (i32, i32) {
    %c0_i32 = arith.constant 0 : i32
    return %arg0, %arg1 : i32, i32
  }
}

</mosaic_0001>

<bundles_post_ra>
// kernel: tpu_custom_call.1
= control target key start
LH: loop header
LB: loop body
LE: loop exit
PB: predicated region body
PF: predicated region fallthrough
CT: control target
= control target key end

     0   :  { %8 = vsyncpa [#allocation3], 0  ;;  %s192_s0 = inlined_call_operand.hbm [shape: f32[2,32], index: 0, kind: input, shape index: {}]   ;;  %s193_s1 = inlined_call_operand.hbm [shape: f32[1,32], index: 1, kind: input, shape index: {}]   ;;  %s194_s2 = inlined_call_operand.vmem [shape: f32[1,32], index: 2, kind: input, shape index: {}]   ;;  %s195_s3 = inlined_call_operand.hbm [shape: f32[2,32], index: 3, kind: output, shape index: {}]  }
   0x1   :  { %9 = vsyncpa [#allocation6], 0 }
   0x2   :  { %10 = vsyncpa [#allocation4], 0  ;;  %s16_s14 = sshll.u32 %s192_s0, 4  ;;  %s157_s15 = smov [#allocation2]   ;;  %s17_s14 = int_to_ptr.hbm [resolvable:$true] %s16_s14 }
   0x3   :  { %s18_s16 = sshll.u32 %s157_s15, 4  ;;  %s27_s19 = sshll.u32 %s193_s1, 4  ;;  %s19_s16 = int_to_ptr.vmem [resolvable:$true] %s18_s16  ;;  %s28_s19 = int_to_ptr.hbm [resolvable:$true] %s27_s19 }
   0x4   :  { %21 = dma.hbm_to_vmem [thread:$0]  %s17_s14, 32, %s19_s16, [#allocation3]  }
   0x5   :  { %s158_s20 = smov [#allocation5]  }
   0x6   :  { %s29_s21 = sshll.u32 %s158_s20, 4  ;;  %s30_s21 = int_to_ptr.vmem [resolvable:$true] %s29_s21 }
   0x7   :  { %32 = dma.hbm_to_vmem [thread:$0]  %s28_s19, 16, %s30_s21, [#allocation6]  }
   0x8   :  { %151 = dma.done.wait [#allocation3], 32  }
   0x9   :  { %152 = vsyncadd [#allocation3], 4294967264 }
   0xa   :  { %153 = dma.done.wait [#allocation6], 16  }
   0xb   :  { %154 = vsyncadd [#allocation6], 4294967280  ;;  %v43_v0 = vld [vmem:[#allocation2] sm:$0x3]  ;;  %v77_v1 = vld [vmem:[#allocation5] ss:$0 sm:$0xff] }
   0xc   :  { %v78_v2 = vld [vmem:[%s194_s2] ss:$0 sm:$0xff]  ;;  %s159_s23 = smov [#allocation7]   ;;  %s63_s26 = sshll.u32 %s195_s3, 4  ;;  %v48_v3 = vmul.f32 %v77_v1, %v43_v0  ;;  %vm54_vm0 = vcmask 254976   ;;  %s64_s26 = int_to_ptr.hbm [resolvable:$true] %s63_s26 }
   0xd   :  { %s61_s24 = sshll.u32 %s159_s23, 4  ;;  %s62_s24 = int_to_ptr.vmem [resolvable:$true] %s61_s24 }
   0xe   :  { %v53_v4 = vadd.f32 %v78_v2, %v48_v3 }
  0x10   :  { %55 = vst.msk [vmem:[#allocation7] sm:$0x3] %vm54_vm0, %v53_v4 }
  0x11   :  { %66 = dma.vmem_to_hbm [thread:$0]  %s62_s24, 32, %s64_s26, [#allocation4]  }
  0x12   :  { %155 = dma.done.wait [#allocation4], 32  }
  0x13   :  { %156 = vsyncadd [#allocation4], 4294967264 }
  0x14   :  { %71 = vsyncpa [#allocation3], 1 }
  0x15   :  { %72 = vsyncpa [#allocation6], 1 }
  0x16   :  { %73 = vsyncpa [#allocation4], 1 }

</bundles_post_ra>
